<compile_context>
chip_gen: v6e
topology: v6e:2x2x1
jax: 0.10.0
libtpu: 0.0.40
codegen_flags: <defaults>
</compile_context>

<pallas_src>
import math

import jax
import jax.numpy as jnp
from jax import lax
from jax.experimental import pallas as pl
from jax.experimental.pallas import tpu as pltpu


def rbf_net_kernel(x_ref, neg2c_ref, params_ref, bias_ref, o_ref):
    # x tile in its natural (TB, F) layout (no wrapper transpose / pad).
    x = x_ref[...]                                              # (TB, F) f32

    # -2 * (c @ x^T) on the MXU, contracting the feature axis of BOTH operands
    # so the result is already lane-major (U, TB).
    m = lax.dot_general(
        neg2c_ref[...], x, (((1,), (1,)), ((), ())),
        preferred_element_type=jnp.float32)                     # (U, TB)

    # ||x_b||^2, also produced directly as a lane-major (1, TB) row via a tiny
    # second MXU op (avoids a cross-lane reduce + relayout on the XLU).
    ones_row = jnp.ones((1, x.shape[1]), jnp.float32)
    xn2 = lax.dot_general(
        ones_row, x * x, (((1,), (1,)), ((), ())),
        preferred_element_type=jnp.float32)                     # (1, TB)

    c_norm2 = params_ref[0]                                     # (U, 1)
    neg_inv_r2 = params_ref[1]                                  # (U, 1)
    w_col = params_ref[2]                                       # (U, 1)

    # Squared distance; clamp tiny negative cancellation residue so it matches
    # the reference's exact (c - x)^2 formulation.
    d2 = jnp.maximum(m + xn2 + c_norm2, 0.0)                    # (U, TB)

    # Gaussian RBF: exp(d2 * (-1/r^2)) on the EUP. fc = Linear(U, 1) as a VPU
    # multiply + sublane reduce (keeps the MXU free), bias from SMEM, sigmoid.
    rbf = jnp.exp(d2 * neg_inv_r2)                              # (U, TB)
    logits = jnp.sum(rbf * w_col, axis=0, keepdims=True) + bias_ref[0]
    o_ref[...] = jax.nn.sigmoid(logits)                         # (1, TB) lane-dense


def _round_up(a, m):
    return ((a + m - 1) // m) * m


def rbf_neural_net(x, c, r, w, b, *, block_b=4096):
    """x: (B, F); c: (U, F); r: (U,); w: (1, U) [torch Linear layout]; b: (1,)."""
    B, F = x.shape
    U = c.shape[0]

    x = x.astype(jnp.float32)
    c = c.astype(jnp.float32)

    # One-time parameter prep (all O(U*F) or smaller).
    neg2c = -2.0 * c                                              # (U, F)
    c_norm2 = jnp.sum(jnp.square(c), axis=1)                      # (U,)
    neg_inv_r2 = -1.0 / jnp.square(r.astype(jnp.float32))         # (U,)
    w_col = w.astype(jnp.float32).reshape(U)                      # (U,)
    params = jnp.stack([c_norm2, neg_inv_r2, w_col]).reshape(3, U, 1)
    bias = b.astype(jnp.float32).reshape(1)                       # (1,) -> SMEM

    # ---- batch tile selection -----------------------------------------------
    # A (tb, F) f32 VMEM tile is lane-padded to multiples of 128, so size tb
    # against a conservative VMEM budget (safe on v7x: 64 MiB physical,
    # 32 MiB default scoped).
    lane = 128
    f_pad = _round_up(F, lane)
    per_row_bytes = 3 * f_pad * 4 + 2 * 8 * 4      # 3-deep x bufs + 2 out bufs
    resident_bytes = _round_up(U, 8) * (f_pad + lane) * 4 * 2
    vmem_budget = 24 * 1024 * 1024
    cap = max(lane, (vmem_budget - resident_bytes) // per_row_bytes)
    # TODO(synk): for very large F, add an "arbitrary" F grid axis with a VMEM
    # accumulator instead of only shrinking tb.

    if B <= min(1024, cap):
        tb = B                                    # single full-extent block
    else:
        tb = min(block_b, cap)
        # Keep >=2 grid steps so the "parallel" batch axis can be split across
        # v7x's two TensorCores (near-zero cost on single-TC v5e/v6e).
        tb = min(tb, _round_up(pl.cdiv(B, 2), lane))
        tb = max(lane, (tb // lane) * lane)

    num_blocks = pl.cdiv(B, tb)

    # Streamed x tile; go to 3-deep buffering only when the grid is long enough
    # for the extra depth to hide residual DMA latency.
    if num_blocks > 2:
        x_spec = pl.BlockSpec((tb, F), lambda i: (i, 0),
                              pipeline_mode=pl.Buffered(3))
    else:
        x_spec = pl.BlockSpec((tb, F), lambda i: (i, 0))

    cost = pl.CostEstimate(
        flops=2 * B * U * F + 4 * B * F + 6 * B * U,
        transcendentals=B * U + B,                 # exp + sigmoid
        bytes_accessed=4 * (B * F + U * F + 3 * U + B + 1),
    )

    out = pl.pallas_call(
        rbf_net_kernel,
        out_shape=jax.ShapeDtypeStruct((1, B), jnp.float32),
        grid_spec=pltpu.PrefetchScalarGridSpec(
            num_scalar_prefetch=0,
            grid=(num_blocks,),
            in_specs=[
                x_spec,                                             # x tile (streamed)
                pl.BlockSpec((U, F), lambda i: (0, 0)),             # -2*c (resident)
                pl.BlockSpec((3, U, 1), lambda i: (0, 0, 0)),       # per-unit params
                pl.BlockSpec(memory_space=pltpu.MemorySpace.SMEM),  # fc bias scalar
            ],
            out_specs=pl.BlockSpec((1, tb), lambda i: (0, i)),
        ),
        compiler_params=pltpu.CompilerParams(
            dimension_semantics=("parallel",),      # megacore-shardable batch axis
            vmem_limit_bytes=32 * 1024 * 1024,      # safe on v5e/v6e/v7x
        ),
        cost_estimate=cost,
    )(x, neg2c, params, bias)

    # (1, B) lane-dense slab -> (B, 1). One dim is 1, so this is just a reshape.
    return out.reshape(B, 1)


def rbf_neural_net_ref(x, c, r, w, b):
    """Pure-JAX reference mirroring the PyTorch forward exactly."""
    d2 = jnp.sum(jnp.square(c[None, :, :] - x[:, None, :]), axis=-1)   # (B, U)
    rbf = jnp.exp(-d2 / jnp.square(r)[None, :])                        # (B, U)
    return jax.nn.sigmoid(rbf @ w.T + b)                               # (B, 1)


if __name__ == "__main__":
    key = jax.random.PRNGKey(0)

    # ---- primary test: module-default sizes (single full-extent block) ----
    B, F, U = 8, 4, 4
    kx, kc, kr, kw, kb = jax.random.split(key, 5)
    x = jax.random.normal(kx, (B, F), jnp.float32)
    c = jax.random.normal(kc, (U, F), jnp.float32)
    r = jax.random.normal(kr, (U,), jnp.float32)
    bound = 1.0 / math.sqrt(U)
    w = jax.random.uniform(kw, (1, U), jnp.float32, minval=-bound, maxval=bound)
    b = jax.random.uniform(kb, (1,), jnp.float32, minval=-bound, maxval=bound)

    out = jax.block_until_ready(rbf_neural_net(x, c, r, w, b))
    ref = rbf_neural_net_ref(x, c, r, w, b)
    assert out.shape == (B, 1)
    assert jnp.allclose(out, ref, atol=1e-5, rtol=1e-5), (out, ref)

    # ---- second test: tiled grid (2 steps) + masked partial last block ----
    B2, F2, U2 = 1600, 4, 16
    k2 = jax.random.split(key, 2)[1]
    kx2, kc2, kr2, kw2, kb2 = jax.random.split(k2, 5)
    x2 = jax.random.normal(kx2, (B2, F2), jnp.float32)
    c2 = jax.random.normal(kc2, (U2, F2), jnp.float32)
    r2 = jax.random.normal(kr2, (U2,), jnp.float32)
    bound2 = 1.0 / math.sqrt(U2)
    w2 = jax.random.uniform(kw2, (1, U2), jnp.float32, minval=-bound2, maxval=bound2)
    b2 = jax.random.uniform(kb2, (1,), jnp.float32, minval=-bound2, maxval=bound2)

    out2 = jax.block_until_ready(rbf_neural_net(x2, c2, r2, w2, b2))
    ref2 = rbf_neural_net_ref(x2, c2, r2, w2, b2)
    assert out2.shape == (B2, 1)
    assert jnp.allclose(out2, ref2, atol=1e-5, rtol=1e-5)

    # ---- third test: long grid -> exercises the Buffered(3) pipeline path ----
    out3 = jax.block_until_ready(rbf_neural_net(x2, c2, r2, w2, b2, block_b=256))
    assert out3.shape == (B2, 1)
    assert jnp.allclose(out3, ref2, atol=1e-5, rtol=1e-5)

    print("KERNEL_OK")
</pallas_src>

<mosaic_0001>
module attributes {stable_mosaic.version = 11 : i64} {
  func.func @rbf_net_kernel(%arg0: i32, %arg1: memref<8x4xf32, #tpu.memory_space<vmem>>, %arg2: memref<4x4xf32, #tpu.memory_space<vmem>>, %arg3: memref<3x4x1xf32, #tpu.memory_space<vmem>>, %arg4: memref<1xf32, #tpu.memory_space<smem>>, %arg5: memref<1x8xf32, #tpu.memory_space<vmem>>) attributes {dimension_semantics = [#tpu.dimension_semantics<parallel>], iteration_bounds = array<i64: 1>, scalar_prefetch = 0 : i64, scratch_operands = 0 : i64, tpu.core_type = #tpu.core_type<tc>, window_params = [{transform_indices = @transform_0, window_bounds = array<i64: 8, 4>}, {pipeline_mode = #tpu.pipeline_mode<synchronous>, transform_indices = @transform_1, window_bounds = array<i64: 4, 4>}, {pipeline_mode = #tpu.pipeline_mode<synchronous>, transform_indices = @transform_2, window_bounds = array<i64: 3, 4, 1>}, {transform_indices = @transform_3, window_bounds = array<i64: 1>}, {transform_indices = @transform_4, window_bounds = array<i64: 1, 8>}]} {
    %c0 = arith.constant 0 : index
    %c0_0 = arith.constant 0 : index
    %0 = vector.load %arg1[%c0, %c0_0] : memref<8x4xf32, #tpu.memory_space<vmem>>, vector<8x4xf32>
    %c0_1 = arith.constant 0 : index
    %c0_2 = arith.constant 0 : index
    %1 = vector.load %arg2[%c0_1, %c0_2] : memref<4x4xf32, #tpu.memory_space<vmem>>, vector<4x4xf32>
    %cst = arith.constant dense<0.000000e+00> : vector<4x8xf32>
    %2 = tpu.matmul %1, %0, %cst {dimension_numbers = #tpu.dot_dimension_numbers<[1], [1], [0], [0], [0, 0, 1, 0], [], []>} : vector<4x4xf32>, vector<8x4xf32>, vector<4x8xf32> -> vector<4x8xf32>
    %cst_3 = arith.constant 1.000000e+00 : f32
    %3 = vector.broadcast %cst_3 : f32 to vector<1x4xf32>
    %4 = arith.mulf %0, %0 : vector<8x4xf32>
    %cst_4 = arith.constant dense<0.000000e+00> : vector<1x8xf32>
    %5 = tpu.matmul %3, %4, %cst_4 {dimension_numbers = #tpu.dot_dimension_numbers<[1], [1], [0], [0], [0, 0, 1, 0], [], []>} : vector<1x4xf32>, vector<8x4xf32>, vector<1x8xf32> -> vector<1x8xf32>
    %c0_5 = arith.constant 0 : index
    %c0_6 = arith.constant 0 : index
    %c0_7 = arith.constant 0 : index
    %6 = vector.load %arg3[%c0_5, %c0_6, %c0_7] : memref<3x4x1xf32, #tpu.memory_space<vmem>>, vector<1x4x1xf32>
    %7 = vector.shape_cast %6 : vector<1x4x1xf32> to vector<4x1xf32>
    %c1 = arith.constant 1 : index
    %c0_8 = arith.constant 0 : index
    %c0_9 = arith.constant 0 : index
    %8 = vector.load %arg3[%c1, %c0_8, %c0_9] : memref<3x4x1xf32, #tpu.memory_space<vmem>>, vector<1x4x1xf32>
    %9 = vector.shape_cast %8 : vector<1x4x1xf32> to vector<4x1xf32>
    %c2 = arith.constant 2 : index
    %c0_10 = arith.constant 0 : index
    %c0_11 = arith.constant 0 : index
    %10 = vector.load %arg3[%c2, %c0_10, %c0_11] : memref<3x4x1xf32, #tpu.memory_space<vmem>>, vector<1x4x1xf32>
    %11 = vector.shape_cast %10 : vector<1x4x1xf32> to vector<4x1xf32>
    %12 = vector.broadcast %5 : vector<1x8xf32> to vector<4x8xf32>
    %13 = arith.addf %2, %12 : vector<4x8xf32>
    %14 = vector.broadcast %7 : vector<4x1xf32> to vector<4x8xf32>
    %15 = arith.addf %13, %14 : vector<4x8xf32>
    %cst_12 = arith.constant 0.000000e+00 : f32
    %16 = vector.broadcast %cst_12 : f32 to vector<4x8xf32>
    %17 = arith.maximumf %15, %16 : vector<4x8xf32>
    %18 = vector.broadcast %9 : vector<4x1xf32> to vector<4x8xf32>
    %19 = arith.mulf %17, %18 : vector<4x8xf32>
    %20 = math.exp %19 : vector<4x8xf32>
    %21 = vector.broadcast %11 : vector<4x1xf32> to vector<4x8xf32>
    %22 = arith.mulf %20, %21 : vector<4x8xf32>
    %cst_13 = arith.constant dense<0.000000e+00> : vector<8xf32>
    %23 = vector.multi_reduction <add>, %22, %cst_13 [0] : vector<4x8xf32> to vector<8xf32>
    %24 = vector.shape_cast %23 : vector<8xf32> to vector<1x8xf32>
    %c0_14 = arith.constant 0 : index
    %25 = memref.load %arg4[%c0_14] : memref<1xf32, #tpu.memory_space<smem>>
    %26 = vector.broadcast %25 : f32 to vector<1x8xf32>
    %27 = arith.addf %24, %26 : vector<1x8xf32>
    %28 = arith.negf %27 : vector<1x8xf32>
    %29 = math.exp %28 : vector<1x8xf32>
    %cst_15 = arith.constant 1.000000e+00 : f32
    %30 = vector.broadcast %cst_15 : f32 to vector<1x8xf32>
    %31 = arith.addf %30, %29 : vector<1x8xf32>
    %32 = arith.divf %30, %31 : vector<1x8xf32>
    %c0_16 = arith.constant 0 : index
    %c0_17 = arith.constant 0 : index
    %33 = vector.load %arg5[%c0_16, %c0_17] : memref<1x8xf32, #tpu.memory_space<vmem>>, vector<1x8xf32>
    tpu.vector_store %arg5[%c0_16, %c0_17], %32 {strides = array<i32>} : memref<1x8xf32, #tpu.memory_space<vmem>>, vector<1x8xf32>,
    return
  }
  func.func @transform_0(%arg0: i32) -> (i32, i32) {
    %c0_i32 = arith.constant 0 : i32
    %c0_i32_0 = arith.constant 0 : i32
    return %arg0, %c0_i32 : i32, i32
  }
  func.func @transform_1(%arg0: i32) -> (i32, i32) {
    %c0_i32 = arith.constant 0 : i32
    %c0_i32_0 = arith.constant 0 : i32
    %c0_i32_1 = arith.constant 0 : i32
    return %c0_i32, %c0_i32_0 : i32, i32
  }
  func.func @transform_2(%arg0: i32) -> (i32, i32, i32) {
    %c0_i32 = arith.constant 0 : i32
    %c0_i32_0 = arith.constant 0 : i32
    %c0_i32_1 = arith.constant 0 : i32
    %c0_i32_2 = arith.constant 0 : i32
    return %c0_i32, %c0_i32_0, %c0_i32_1 : i32, i32, i32
  }
  func.func @transform_3(%arg0: i32) -> i32 {
    %c0_i32 = arith.constant 0 : i32
    %c0_i32_0 = arith.constant 0 : i32
    return %c0_i32 : i32
  }
  func.func @transform_4(%arg0: i32) -> (i32, i32) {
    %c0_i32 = arith.constant 0 : i32
    %c0_i32_0 = arith.constant 0 : i32
    return %c0_i32, %arg0 : i32, i32
  }
}

</mosaic_0001>

<bundles_post_ra>
// kernel: tpu_custom_call.1
= control target key start
LH: loop header
LB: loop body
LE: loop exit
PB: predicated region body
PF: predicated region fallthrough
CT: control target
= control target key end

     0   :  { %vm22_vm0 = vcmask 31744   ;;  %v294_v1 = vmov 0.0   ;;  %vm295_vm1 = vmmov 0   ;;  %s349_s0 = inlined_call_operand.vmem [shape: f32[8,4], index: 0, kind: input, shape index: {}]   ;;  %s350_s1 = inlined_call_operand.vmem [shape: f32[4,4], index: 1, kind: input, shape index: {}]   ;;  %s351_s2 = inlined_call_operand.vmem [shape: f32[3,4,1], index: 2, kind: input, shape index: {}]   ;;  %s352_s3 = inlined_call_operand.<no memory space> [shape: f32[1], index: 3, kind: input, shape index: {}]   ;;  %s353_s4 = inlined_call_operand.hbm [shape: f32[1,8], index: 4, kind: output, shape index: {}]  }
   0x1   :  { %v19_v0 = vld [vmem:[%s349_s0] sm:$0xff]  ;;  %249 = vmatprep.subr.mxu0 %v294_v1  ;;  %254 = vmatprep.subr.mxu1 %v294_v1 }
   0x2   :  { %v21_v2 = vmul.f32 %v19_v0, %v19_v0  ;;  %255 = vmatpush3.xpose.msk.msra.mxu1 %vm22_vm0, %v19_v0  ;;  %251 = vmatprep.mubr.msk.f32.mxu0 %vm295_vm1, %v294_v1  ;;  %v20_v3 = vld [vmem:[%s350_s1] sm:$0xf] }
   0x3   :  { %v99_v4 = vld [vmem:[%s351_s2] sm:$0xf] }
   0x4   :  { %10 = vsyncpa [#allocation4], 0  ;;  %250 = vmatpush3.xpose.msk.msra.mxu0 %vm22_vm0, %v21_v2  ;;  %256 = vmatprep.mubr.msk.f32.mxu1 %vm295_vm1, %v294_v1  ;;  %v241_v5 = vld [vmem:[%s351_s2 + $0x8] sm:$0xf]  ;;  %v296_v6 = vmov 0   ;;  %v297_v7 = vmov 1.0   ;;  %v104_v9 = vlaneseq  ;;  %v214_v33 = vstv %s352_s3 }
   0x5   :  { %264 = vset.pattern.permute.xlu0 %v296_v6  ;;  %265 = vset.pattern.permute.xlu1 %v296_v6  ;;  %v240_v8 = vld [vmem:[%s351_s2 + $0x4] sm:$0xf]  ;;  %vm205_vm2 = vcmask 60416   ;;  %s298_s24 = smov [#allocation3]   ;;  %vm222_vm3 = vcmask 57344  }
   0x6   :  { %257 = vmatmul.mubr.msk.f32.vlgmr.msra.gmra.mxu1 %vm22_vm0, %v20_v3  ;;  %186 = vperm.xlu0 %264, %v99_v4   ;;  %v105_v10 = vshrl.u32 %v104_v9, 7  ;;  %s230_s25 = sshll.u32 %s298_s24, 4  ;;  %s231_s25 = int_to_ptr.vmem [resolvable:$true] %s230_s25 }
   0x7   :  { %252 = vmatmul.mubr.msk.f32.vlgmr.msra.gmra.mxu0 %vm22_vm0, %v297_v7  ;;  %201 = vperm.xlu1 %265, %v241_v5   ;;  %s272_s26 = scalar_lea.vmem %s231_s25, 16  ;;  %s276_s27 = scalar_lea.vmem %s231_s25, 32 }
   0x8   :  { %v106_v11 = vsub.s32 0, %v105_v10  ;;  %p273_p0 = scmp.ne.s32.totalorder %s231_s25, %s272_s26  ;;  %p277_p1 = scmp.lt.s32.totalorder %s231_s25, %s231_s25 }
   0x9   :  { %p278_p2 = scmp.lt.s32.totalorder %s276_s27, %s272_s26 }
   0xa   :  { %193 = vperm.xlu0 %264, %v240_v8  }
   0xb   :  { %p279_p3 = por %p278_p2, %p277_p1 }
   0xd   :  { %p280_p4 = pnand %p279_p3, %p273_p0 }
  0x81   :  { %v187_v16 = vpop.permute.xlu0 %186 }
  0x82   :  { %v202_v24 = vpop.permute.xlu1 %201 }
  0x85   :  { %v194_v21 = vpop.permute.xlu0 %193 }
  0xc6   :  { %v180_v12 = vpop.f32.mrf.mxu1 }
  0xc7   :  { %v95_v13 = vpop.f32.mrf.mxu0 }
  0xc8   :  { %v107_v14 = vrot.slane %v95_v13, %v106_v11  ;;  %v258_v15 = vpop.f32.mrf.mxu1 }
  0xc9   :  { %v253_v17 = vpop.f32.mrf.mxu0 }
  0xca   :  { %v181_v18 = vadd.f32 %v180_v12, %v107_v14 }
  0xcc   :  { %v189_v19 = vadd.f32 %v187_v16, %v181_v18 }
  0xce   :  { %v190_v20 = vmax.f32 %v189_v19, 0.0 }
  0xd0   :  { %v196_v22 = vmul.f32 %v194_v21, %v190_v20 }
  0xd2   :  { %v197_v23 = vmul.f32 1.442695, %v196_v22 }
  0xd4   :  { %266 = vpow2.f32 %v197_v23 }
  0xe1   :  { %v267_v25 = vpop.eup %266 }
  0xe2   :  { %v204_v26 = vmul.f32 %v267_v25, %v202_v24 }
  0xe4   :  { %v206_v27 = vsel %vm205_vm2, %v204_v26, 0.0 }
  0xe5   :  { %v207_v28 = vrot.slane %v206_v27, 4 }
  0xe7   :  { %v208_v29 = vadd.f32 %v207_v28, %v206_v27 }
  0xe9   :  { %v209_v30 = vrot.slane %v208_v29, 2 }
  0xeb   :  { %v210_v31 = vadd.f32 %v209_v30, %v208_v29 }
  0xed   :  { %v211_v32 = vrot.slane %v210_v31, 1 }
  0xef   :  { %v212_v34 = vadd.f32 %v211_v32, %v210_v31 }
  0xf1   :  { %v215_v35 = vadd.f32 %v214_v33, %v212_v34 }
  0xf3   :  { %v244_v36 = vmul.f32 -1.442695, %v215_v35 }
  0xf5   :  { %268 = vpow2.f32 %v244_v36 }
 0x102   :  { %v269_v37 = vpop.eup %268 }
 0x103   :  { %v219_v38 = vadd.f32 1.0, %v269_v37 }
 0x105   :  { %270 = vrcp.f32 %v219_v38 }
 0x112   :  { %v271_v39 = vpop.eup %270 }
 0x113   :  { %223 = vst.msk [vmem:[#allocation3] sm:$0x1] %vm222_vm3, %v271_v39 }
 0x114   :  { %283 = shalt.err (!%p280_p4)
}
 0x115   :  { %233 = dma.vmem_to_hbm [thread:$0]  %s231_s25, 16, %s353_s4, [#allocation4]  }
 0x116   :  { %292 = dma.done.wait [#allocation4], 16  }
 0x117   :  { %293 = vsyncadd [#allocation4], 4294967280 }
 0x118   :  { %237 = vsyncpa [#allocation4], 1 }

</bundles_post_ra>
